<compile_context>
chip_gen: v6e
topology: v6e:2x2x1
jax: 0.10.0
libtpu: 0.0.40
codegen_flags: <defaults>
</compile_context>

<pallas_src>
import functools
from typing import List, Sequence, Tuple

import jax
import jax.numpy as jnp
from jax.experimental import pallas as pl
from jax.experimental.pallas import tpu as pltpu


# ----------------------------------------------------------------------------
# Generation detection / budgets
# ----------------------------------------------------------------------------
@functools.lru_cache(maxsize=1)
def _tpu_gen():
    try:
        kind = jax.devices()[0].device_kind.lower()
    except Exception:
        kind = ""
    if "v7" in kind:          # 64 MiB VMEM per TC, 2 TCs/chip, 256x256 MXU
        return {"name": "v7x", "mxu": 256, "n_cores": 2,
                "tile_budget": 40 << 20, "fused_budget": 44 << 20,
                "vmem_limit": 48 << 20}
    if "v6" in kind:          # 128 MiB VMEM, 1 TC, 256x256 MXU
        return {"name": "v6e", "mxu": 256, "n_cores": 1,
                "tile_budget": 80 << 20, "fused_budget": 100 << 20,
                "vmem_limit": 100 << 20}
    if "v5" in kind:          # 128 MiB VMEM, 1 TC (v5e), 128x128 MXU
        return {"name": "v5e", "mxu": 128, "n_cores": 2 if "v5p" in kind else 1,
                "tile_budget": 80 << 20, "fused_budget": 100 << 20,
                "vmem_limit": 100 << 20}
    # Unknown generation: conservative (v7x-like) ceilings, 128 alignment.
    return {"name": "unknown", "mxu": 128, "n_cores": 2,
            "tile_budget": 36 << 20, "fused_budget": 40 << 20,
            "vmem_limit": 48 << 20}


# ----------------------------------------------------------------------------
# Helpers
# ----------------------------------------------------------------------------
def _round_up(v: int, m: int) -> int:
    return ((v + m - 1) // m) * m


def init_mlp_params(key: jax.Array, sizes: Tuple[int, ...]):
    """Deterministic init matching nn.Linear shapes: W (out, in), b (out,)."""
    params = []
    for i in range(len(sizes) - 1):
        key, kw, kb = jax.random.split(key, 3)
        fan_in, fan_out = sizes[i], sizes[i + 1]
        bound = 1.0 / jnp.sqrt(fan_in)
        w = jax.random.uniform(kw, (fan_out, fan_in), jnp.float32, -bound, bound)
        b = jax.random.uniform(kb, (fan_out,), jnp.float32, -bound, bound)
        params.append((w, b))
    return params


def prepare_params(params: Sequence[Tuple[jax.Array, jax.Array]],
                   pad_to: int = None,
                   weight_dtype=jnp.bfloat16):
    """Transpose W -> (K, N), cast weights to bf16, reshape b -> (1, N) f32, ONCE.

    If `pad_to` is given, zero-pad K and N up to multiples of `pad_to` so neither
    path pads per call; zero padding is exact for the matmul and tanh(0)=0 keeps
    padded feature columns zero across layers.
    """
    prepared = []
    for w, b in params:
        w_t = jnp.asarray(w).T.astype(weight_dtype)       # (K, N), bf16 for MXU
        b2 = jnp.asarray(b).reshape(1, -1).astype(jnp.float32)  # (1, N), f32 bias
        if pad_to is not None:
            K, N = w_t.shape
            Kp, Np = _round_up(K, pad_to), _round_up(N, pad_to)
            w_t = jnp.pad(w_t, ((0, Kp - K), (0, Np - N)))
            b2 = jnp.pad(b2, ((0, 0), (0, Np - N)))
        prepared.append((w_t, b2))
    return prepared


# ----------------------------------------------------------------------------
# Path 1: whole MLP fused into a single kernel (small / mid models).
# ----------------------------------------------------------------------------
def _fused_mlp_kernel(*refs, n_layers: int, compute_dtype):
    x_ref = refs[0]
    o_ref = refs[-1]
    wb_refs = refs[1:-1]                 # (w0, b0, w1, b1, ...)

    h = x_ref[...]
    for i in range(n_layers):
        w = wb_refs[2 * i][...]          # (K_i, N_i) bf16
        b = wb_refs[2 * i + 1][...]      # (1,  N_i) f32
        acc = jnp.dot(h, w, preferred_element_type=jnp.float32) + b
        if i < n_layers - 1:             # Tanh between hidden layers only
            h = jnp.tanh(acc).astype(compute_dtype)   # back to bf16 for next MXU pass
        else:
            h = acc
    o_ref[...] = h.astype(o_ref.dtype)


def mlp_forward_fused(prepared: Sequence[Tuple[jax.Array, jax.Array]],
                      x: jax.Array, out_features: int,
                      compute_dtype=jnp.bfloat16) -> jax.Array:
    """Entire MLP in one pallas_call; weights + activations resident in VMEM."""
    gen = _tpu_gen()
    n_layers = len(prepared)
    M, K = x.shape
    K0p = prepared[0][0].shape[0]
    Np_out = prepared[-1][0].shape[1]

    # bf16 sublane packing wants batch rows in multiples of 16.
    Mp = _round_up(M, 16)
    xp = x
    if (Mp, K0p) != (M, K):
        xp = jnp.pad(x, ((0, Mp - M), (0, K0p - K)))
    xp = xp.astype(compute_dtype)

    flat: List[jax.Array] = []
    total = xp.size * xp.dtype.itemsize + Mp * Np_out * 4
    max_n = Np_out
    for w_t, b2 in prepared:
        flat += [w_t, b2]
        total += w_t.size * w_t.dtype.itemsize + b2.size * b2.dtype.itemsize
        max_n = max(max_n, w_t.shape[1])
    total += 4 * Mp * max_n * 4          # headroom for f32 intermediates
    assert total < gen["fused_budget"], (
        "model too large for the fused path on this TPU generation; "
        "use mlp_forward_tiled")

    vmem_spec = pl.BlockSpec(memory_space=pltpu.MemorySpace.VMEM)
    y = pl.pallas_call(
        functools.partial(_fused_mlp_kernel, n_layers=n_layers,
                          compute_dtype=compute_dtype),
        out_shape=jax.ShapeDtypeStruct((Mp, Np_out), jnp.float32),
        in_specs=[vmem_spec] * (1 + 2 * n_layers),
        out_specs=vmem_spec,
        compiler_params=pltpu.CompilerParams(
            vmem_limit_bytes=int(gen["fused_budget"])),
    )(xp, *flat)
    return y[:M, :out_features]


# ----------------------------------------------------------------------------
# Path 2: per-layer tiled matmul (large models).
# ----------------------------------------------------------------------------
def _linear_kernel_acc(x_ref, w_ref, b_ref, o_ref, acc_ref, *, apply_act: bool):
    """out = act(x @ w + b), f32 scratch accumulator (used for bf16 outputs)."""
    k = pl.program_id(2)

    @pl.when(k == 0)
    def _():
        acc_ref[...] = jnp.zeros_like(acc_ref)

    acc_ref[...] += jnp.dot(x_ref[...], w_ref[...],
                            preferred_element_type=jnp.float32)

    @pl.when(k == pl.num_programs(2) - 1)
    def _():
        out = acc_ref[...] + b_ref[...]
        if apply_act:
            out = jnp.tanh(out)
        o_ref[...] = out.astype(o_ref.dtype)


def _linear_kernel_inplace(x_ref, w_ref, b_ref, o_ref, *, apply_act: bool):
    """Same, but accumulates directly into the resident f32 output block."""
    k = pl.program_id(2)

    @pl.when(k == 0)
    def _():
        o_ref[...] = jnp.zeros_like(o_ref)

    o_ref[...] += jnp.dot(x_ref[...], w_ref[...],
                          preferred_element_type=jnp.float32)

    @pl.when(k == pl.num_programs(2) - 1)
    def _():
        out = o_ref[...] + b_ref[...]
        if apply_act:
            out = jnp.tanh(out)
        o_ref[...] = out


def _tile_bytes(tm, tn, tk, x_item, w_item, out_item, use_acc):
    b = 2 * (tm * tk * x_item + tk * tn * w_item)   # double-buffered inputs
    b += 2 * tm * tn * out_item                     # double-buffered output
    b += 2 * tn * 4                                 # bias blocks (f32)
    if use_acc:
        b += tm * tn * 4                            # scratch accumulator
    return b


def _candidates(dim, base):
    cands = sorted({c for c in base if 0 < c <= dim and dim % c == 0},
                   reverse=True)
    return cands or [dim]


def _choose_tiles(M, N, K, x_item, w_item, out_item, use_acc, gen):
    # Prefer tm = full padded batch: each weight is streamed from HBM once.
    tm_c = _candidates(M, (M, 1024, 512, 256, 128))
    tn_c = _candidates(N, (512, 256, 128))
    tk_c = _candidates(K, (2048, 1024, 512, 256, 128))
    im = jn = ik = 0

    def cur():
        return tm_c[im], tn_c[jn], tk_c[ik]

    while _tile_bytes(*cur(), x_item, w_item, out_item, use_acc) > gen["tile_budget"]:
        if ik + 1 < len(tk_c):
            ik += 1
        elif jn + 1 < len(tn_c):
            jn += 1
        elif im + 1 < len(tm_c):
            im += 1
        else:
            break
    tm, tn, tk = cur()

    # v7x: both TensorCores need a parallel grid slice; split N (or M) if needed.
    if gen["n_cores"] >= 2 and (M // tm) * (N // tn) < 2:
        if tn % 256 == 0:
            tn //= 2
        elif tm % 256 == 0:
            tm //= 2
    return tm, tn, tk


def pallas_linear_tiled(x: jax.Array, w_t: jax.Array, b2: jax.Array,
                        apply_act: bool, out_dtype=None) -> jax.Array:
    """y = act(x @ w_t + b).  All dims must already be tile-aligned (pre-padded)."""
    M, K = x.shape
    K2, N = w_t.shape
    assert K == K2 and b2.shape == (1, N)
    out_dtype = jnp.dtype(out_dtype or x.dtype)
    gen = _tpu_gen()
    use_acc = out_dtype != jnp.float32          # f32 output -> accumulate in place

    tm, tn, tk = _choose_tiles(M, N, K, x.dtype.itemsize, w_t.dtype.itemsize,
                               out_dtype.itemsize, use_acc, gen)
    # Alignment guard (feedback: the full-dim fallback must never be unaligned).
    assert M % tm == 0 and N % tn == 0 and K % tk == 0
    assert (tn % 128 == 0 or tn == N) and (tk % 128 == 0 or tk == K)

    grid = (M // tm, N // tn, K // tk)
    est = _tile_bytes(tm, tn, tk, x.dtype.itemsize, w_t.dtype.itemsize,
                      out_dtype.itemsize, use_acc)
    vmem_limit = int(max(32 << 20, min(gen["vmem_limit"], 2 * est)))

    in_specs = [
        pl.BlockSpec((tm, tk), lambda i, j, k: (i, k)),
        pl.BlockSpec((tk, tn), lambda i, j, k: (k, j)),
        pl.BlockSpec((1, tn), lambda i, j, k: (0, j)),
    ]
    out_spec = pl.BlockSpec((tm, tn), lambda i, j, k: (i, j))

    if use_acc:
        kernel = functools.partial(_linear_kernel_acc, apply_act=apply_act)
        scratch = [pltpu.VMEM((tm, tn), jnp.float32)]
    else:
        kernel = functools.partial(_linear_kernel_inplace, apply_act=apply_act)
        scratch = []

    return pl.pallas_call(
        kernel,
        out_shape=jax.ShapeDtypeStruct((M, N), out_dtype),
        grid_spec=pltpu.PrefetchScalarGridSpec(
            num_scalar_prefetch=0,
            grid=grid,
            in_specs=in_specs,
            out_specs=out_spec,
            scratch_shapes=scratch,
        ),
        compiler_params=pltpu.CompilerParams(
            # K (reduction) stays the innermost "arbitrary" axis.
            dimension_semantics=("parallel", "parallel", "arbitrary"),
            vmem_limit_bytes=vmem_limit,
        ),
    )(x, w_t, b2)


def mlp_forward_tiled(prepared_padded: Sequence[Tuple[jax.Array, jax.Array]],
                      x: jax.Array, out_features: int,
                      compute_dtype=jnp.bfloat16) -> jax.Array:
    """Layer-by-layer tiled forward.  Pads + casts x once, slices once at the end."""
    # TODO(synk): optionally fuse consecutive layers into one kernel (activations
    # resident in VMEM, weights streamed) to remove per-layer HBM round-trips.
    M, K = x.shape
    Kp = prepared_padded[0][0].shape[0]
    Mp = _round_up(max(M, 128), 128)                 # at least 128 rows
    if (Mp, Kp) != (M, K):
        x = jnp.pad(x, ((0, Mp - M), (0, Kp - K)))   # once, not per layer
    h = x.astype(compute_dtype)                      # bf16 into the MXU

    n = len(prepared_padded)
    for i, (w_t, b2) in enumerate(prepared_padded):
        last = (i == n - 1)
        h = pallas_linear_tiled(
            h, w_t, b2, apply_act=not last,
            out_dtype=(jnp.float32 if last else compute_dtype))
    return h[:M, :out_features]


# ----------------------------------------------------------------------------
# Reference
# ----------------------------------------------------------------------------
def mlp_reference(params, x):
    n = len(params)
    for i, (w, b) in enumerate(params):
        x = x @ w.T + b
        if i < n - 1:
            x = jnp.tanh(x)
    return x


if __name__ == "__main__":
    key = jax.random.PRNGKey(0)
    k_params, k_x, k2_params, k2_x = jax.random.split(key, 4)
    gen = _tpu_gen()

    # ---- small MLP (the module's typical use): single fused kernel ----------
    sizes = (32, 64, 32, 16)     # Linear(32,64) Tanh Linear(64,32) Tanh Linear(32,16)
    batch = 8
    params = init_mlp_params(k_params, sizes)
    x = jax.random.normal(k_x, (batch, sizes[0]), jnp.float32)

    # pad features to 128 once -> lane-dense dots/stores; slice once at the end.
    fused_prepared = prepare_params(params, pad_to=128)
    y = jax.block_until_ready(mlp_forward_fused(fused_prepared, x, sizes[-1]))
    y_ref = mlp_reference(params, x)
    assert y.shape == (batch, sizes[-1])
    # bf16 MXU inputs (f32 accumulation) vs f32 reference -> looser tolerance.
    assert jnp.allclose(y, y_ref, atol=3e-2, rtol=3e-2), \
        float(jnp.max(jnp.abs(y - y_ref)))

    # ---- larger MLP: tiled per-layer path (pre-padded bf16 weights) ---------
    sizes2 = (300, 600, 200)     # deliberately non-aligned to exercise padding
    batch2 = 100                 # non-aligned batch to exercise M padding
    params2 = init_mlp_params(k2_params, sizes2)
    x2 = jax.random.normal(k2_x, (batch2, sizes2[0]), jnp.float32)

    tiled_prepared = prepare_params(params2, pad_to=gen["mxu"])   # 256 on v6e/v7x
    y2 = jax.block_until_ready(mlp_forward_tiled(tiled_prepared, x2, sizes2[-1]))
    y2_ref = mlp_reference(params2, x2)
    assert y2.shape == (batch2, sizes2[-1])
    assert jnp.allclose(y2, y2_ref, atol=3e-2, rtol=3e-2), \
        float(jnp.max(jnp.abs(y2 - y2_ref)))

    print("KERNEL_OK")
</pallas_src>

<mosaic_0001>
module attributes {stable_mosaic.version = 11 : i64} {
  func.func @_fused_mlp_kernel(%arg0: memref<16x128xbf16, #tpu.memory_space<vmem>>, %arg1: memref<128x128xbf16, #tpu.memory_space<vmem>>, %arg2: memref<1x128xf32, #tpu.memory_space<vmem>>, %arg3: memref<128x128xbf16, #tpu.memory_space<vmem>>, %arg4: memref<1x128xf32, #tpu.memory_space<vmem>>, %arg5: memref<128x128xbf16, #tpu.memory_space<vmem>>, %arg6: memref<1x128xf32, #tpu.memory_space<vmem>>, %arg7: memref<16x128xf32, #tpu.memory_space<vmem>>) attributes {dimension_semantics = [], scalar_prefetch = 0 : i64, scratch_operands = 0 : i64, tpu.core_type = #tpu.core_type<tc>} {
    %c0 = arith.constant 0 : index
    %c0_0 = arith.constant 0 : index
    %0 = vector.load %arg0[%c0, %c0_0] : memref<16x128xbf16, #tpu.memory_space<vmem>>, vector<16x128xbf16>
    %c0_1 = arith.constant 0 : index
    %c0_2 = arith.constant 0 : index
    %1 = vector.load %arg1[%c0_1, %c0_2] : memref<128x128xbf16, #tpu.memory_space<vmem>>, vector<128x128xbf16>
    %c0_3 = arith.constant 0 : index
    %c0_4 = arith.constant 0 : index
    %2 = vector.load %arg2[%c0_3, %c0_4] : memref<1x128xf32, #tpu.memory_space<vmem>>, vector<1x128xf32>
    %cst = arith.constant dense<0.000000e+00> : vector<16x128xf32>
    %3 = tpu.matmul %0, %1, %cst {dimension_numbers = #tpu.dot_dimension_numbers<[1], [0], [0], [1], [0, 0, 1, 1], [], []>} : vector<16x128xbf16>, vector<128x128xbf16>, vector<16x128xf32> -> vector<16x128xf32>
    %4 = vector.broadcast %2 : vector<1x128xf32> to vector<16x128xf32>
    %5 = arith.addf %3, %4 : vector<16x128xf32>
    %6 = math.tanh %5 : vector<16x128xf32>
    %7 = arith.truncf %6 : vector<16x128xf32> to vector<16x128xbf16>
    %c0_5 = arith.constant 0 : index
    %c0_6 = arith.constant 0 : index
    %8 = vector.load %arg3[%c0_5, %c0_6] : memref<128x128xbf16, #tpu.memory_space<vmem>>, vector<128x128xbf16>
    %c0_7 = arith.constant 0 : index
    %c0_8 = arith.constant 0 : index
    %9 = vector.load %arg4[%c0_7, %c0_8] : memref<1x128xf32, #tpu.memory_space<vmem>>, vector<1x128xf32>
    %cst_9 = arith.constant dense<0.000000e+00> : vector<16x128xf32>
    %10 = tpu.matmul %7, %8, %cst_9 {dimension_numbers = #tpu.dot_dimension_numbers<[1], [0], [0], [1], [0, 0, 1, 1], [], []>} : vector<16x128xbf16>, vector<128x128xbf16>, vector<16x128xf32> -> vector<16x128xf32>
    %11 = vector.broadcast %9 : vector<1x128xf32> to vector<16x128xf32>
    %12 = arith.addf %10, %11 : vector<16x128xf32>
    %13 = math.tanh %12 : vector<16x128xf32>
    %14 = arith.truncf %13 : vector<16x128xf32> to vector<16x128xbf16>
    %c0_10 = arith.constant 0 : index
    %c0_11 = arith.constant 0 : index
    %15 = vector.load %arg5[%c0_10, %c0_11] : memref<128x128xbf16, #tpu.memory_space<vmem>>, vector<128x128xbf16>
    %c0_12 = arith.constant 0 : index
    %c0_13 = arith.constant 0 : index
    %16 = vector.load %arg6[%c0_12, %c0_13] : memref<1x128xf32, #tpu.memory_space<vmem>>, vector<1x128xf32>
    %cst_14 = arith.constant dense<0.000000e+00> : vector<16x128xf32>
    %17 = tpu.matmul %14, %15, %cst_14 {dimension_numbers = #tpu.dot_dimension_numbers<[1], [0], [0], [1], [0, 0, 1, 1], [], []>} : vector<16x128xbf16>, vector<128x128xbf16>, vector<16x128xf32> -> vector<16x128xf32>
    %18 = vector.broadcast %16 : vector<1x128xf32> to vector<16x128xf32>
    %19 = arith.addf %17, %18 : vector<16x128xf32>
    %c0_15 = arith.constant 0 : index
    %c0_16 = arith.constant 0 : index
    %20 = vector.load %arg7[%c0_15, %c0_16] : memref<16x128xf32, #tpu.memory_space<vmem>>, vector<16x128xf32>
    tpu.vector_store %arg7[%c0_15, %c0_16], %19 {strides = array<i32>} : memref<16x128xf32, #tpu.memory_space<vmem>>, vector<16x128xf32>,
    return
  }
}

</mosaic_0001>

<bundles_post_ra>
// kernel: tpu_custom_call.1
= control target key start
LH: loop header
LB: loop body
LE: loop exit
PB: predicated region body
PF: predicated region fallthrough
CT: control target
= control target key end

     0   :  { %12 = vsyncpa [#allocation3], 0  ;;  %s838_s0 = inlined_call_operand.hbm [shape: bf16[16,128], index: 0, kind: input, shape index: {}]   ;;  %s839_s1 = inlined_call_operand.hbm [shape: bf16[128,128], index: 1, kind: input, shape index: {}]   ;;  %s840_s2 = inlined_call_operand.vmem [shape: f32[1,128], index: 2, kind: input, shape index: {}]   ;;  %s841_s3 = inlined_call_operand.hbm [shape: bf16[128,128], index: 3, kind: input, shape index: {}]   ;;  %s842_s4 = inlined_call_operand.vmem [shape: f32[1,128], index: 4, kind: input, shape index: {}]   ;;  %s843_s5 = inlined_call_operand.hbm [shape: bf16[128,128], index: 5, kind: input, shape index: {}]   ;;  %s844_s6 = inlined_call_operand.vmem [shape: f32[1,128], index: 6, kind: input, shape index: {}]   ;;  %s845_s7 = inlined_call_operand.hbm [shape: f32[16,128], index: 7, kind: output, shape index: {}]  }
   0x1   :  { %13 = vsyncpa [#allocation6], 0 }
   0x2   :  { %14 = vsyncpa [#allocation9], 0 }
   0x3   :  { %15 = vsyncpa [#allocation4], 0  ;;  %s721_s24 = smov [#allocation5]   ;;  %s722_s26 = smov [#allocation2]  }
   0x4   :  { %s33_s25 = sshll.u32 %s721_s24, 4  ;;  %s21_s27 = sshll.u32 %s722_s26, 4  ;;  %s34_s25 = int_to_ptr.vmem [resolvable:$true] %s33_s25  ;;  %s22_s27 = int_to_ptr.vmem [resolvable:$true] %s21_s27 }
   0x5   :  { %s621_s28 = scalar_lea.vmem %s34_s25, 1024  ;;  %p626_p1 = scmp.lt.s32.totalorder %s34_s25, %s34_s25 }
   0x6   :  { %p622_p0 = scmp.ne.s32.totalorder %s34_s25, %s621_s28  ;;  %p627_p2 = scmp.lt.s32.totalorder %s621_s28, %s621_s28 }
   0x8   :  { %p628_p3 = por %p627_p2, %p626_p1 }
   0xa   :  { %p629_p4 = pnand %p628_p3, %p622_p0 }
   0xc   :  { %632 = shalt.err (!%p629_p4)
}
   0xd   :  { %s723_s29 = smov 64   ;;  %s724_s30 = smov 4  }
   0xe   :  { %39 = dma.hbm_to_vmem [thread:$0]  %s839_s1, 1024, %s34_s25, [#allocation6], %s723_s29, %s723_s29, %s724_s30  }
   0xf   :  { %s641_s10 = scalar_lea.vmem %s22_s27, 128  ;;  %p646_p6 = scmp.lt.s32.totalorder %s22_s27, %s22_s27 }
  0x10   :  { %p642_p5 = scmp.ne.s32.totalorder %s22_s27, %s641_s10  ;;  %p647_p7 = scmp.lt.s32.totalorder %s641_s10, %s641_s10 }
  0x12   :  { %p648_p8 = por %p647_p7, %p646_p6 }
  0x14   :  { %p649_p9 = pnand %p648_p8, %p642_p5 }
  0x16   :  { %652 = shalt.err (!%p649_p9)
}
  0x17   :  { %27 = dma.hbm_to_vmem [thread:$0]  %s838_s0, 128, %s22_s27, [#allocation3], %s723_s29, %s723_s29, %s724_s30  }
  0x18   :  { %s725_s13 = smov [#allocation7]   ;;  %s726_s15 = smov [#allocation8]  }
  0x19   :  { %s47_s14 = sshll.u32 %s725_s13, 4  ;;  %s61_s16 = sshll.u32 %s726_s15, 4  ;;  %s48_s14 = int_to_ptr.vmem [resolvable:$true] %s47_s14  ;;  %s62_s16 = int_to_ptr.vmem [resolvable:$true] %s61_s16 }
  0x1a   :  { %s661_s1 = scalar_lea.vmem %s48_s14, 1024  ;;  %p666_p11 = scmp.lt.s32.totalorder %s48_s14, %s48_s14 }
  0x1b   :  { %p662_p10 = scmp.ne.s32.totalorder %s48_s14, %s661_s1  ;;  %p667_p12 = scmp.lt.s32.totalorder %s661_s1, %s661_s1 }
  0x1d   :  { %p668_p13 = por %p667_p12, %p666_p11 }
  0x1f   :  { %p669_p0 = pnand %p668_p13, %p662_p10 }
  0x21   :  { %672 = shalt.err (!%p669_p0)
}
  0x22   :  { %53 = dma.hbm_to_vmem [thread:$0]  %s841_s3, 1024, %s48_s14, [#allocation6], %s723_s29, %s723_s29, %s724_s30  }
  0x23   :  { %s681_s0 = scalar_lea.vmem %s62_s16, 1024  ;;  %p686_p2 = scmp.lt.s32.totalorder %s62_s16, %s62_s16 }
  0x24   :  { %p682_p1 = scmp.ne.s32.totalorder %s62_s16, %s681_s0  ;;  %p687_p3 = scmp.lt.s32.totalorder %s681_s0, %s681_s0 }
  0x26   :  { %p688_p4 = por %p687_p3, %p686_p2 }
  0x28   :  { %p689_p5 = pnand %p688_p4, %p682_p1 }
  0x2a   :  { %692 = shalt.err (!%p689_p5)
}
  0x2b   :  { %67 = dma.hbm_to_vmem [thread:$0]  %s843_s5, 1024, %s62_s16, [#allocation9], %s723_s29, %s723_s29, %s724_s30  }
  0x2c   :  { %713 = dma.done.wait [#allocation3], 128  }
  0x2d   :  { %714 = vsyncadd [#allocation3], 4294967168 }
  0x2e   :  { %715 = dma.done.wait [#allocation6], 2048  }
  0x2f   :  { %716 = vsyncadd [#allocation6], 4294965248 }
  0x30   :  { %717 = dma.done.wait [#allocation9], 1024  }
  0x31   :  { %718 = vsyncadd [#allocation9], 4294966272  ;;  %v727_v0 = vmov 0.0   ;;  %vm728_vm0 = vmmov 0   ;;  %v580_v1 = vld [vmem:[#allocation5 + $0x38] sm:$0xff]   ;;  %v581_v2 = vld [vmem:[#allocation5 + $0x30] sm:$0xff]  }
  0x32   :  { %509 = vmatprep.subr.bf16.mxu0 %v727_v0  ;;  %525 = vmatprep.mubr.msk.bf16.mxu0 %vm728_vm0, %v727_v0  ;;  %v582_v3 = vld [vmem:[#allocation5 + $0x28] sm:$0xff]   ;;  %v589_v4 = vld [vmem:[#allocation7 + $0x38] sm:$0xff]   ;;  %v583_v5 = vld [vmem:[#allocation5 + $0x20] sm:$0xff]   ;;  %s729_s24 = smov [#allocation10]  }
  0x33   :  { %529 = vmatprep.subr.bf16.mxu1 %v727_v0  ;;  %545 = vmatprep.mubr.msk.bf16.mxu1 %vm728_vm0, %v727_v0  ;;  %v590_v6 = vld [vmem:[#allocation7 + $0x30] sm:$0xff]   ;;  %v584_v7 = vld [vmem:[#allocation5 + $0x18] sm:$0xff]   ;;  %v586_v9 = vld [vmem:[#allocation5 + $0x8] sm:$0xff]  }
  0x34   :  { %510 = vmatpush3.bf16.msra.mxu0 %v580_v1  ;;  %530 = vmatpush3.bf16.msra.mxu1 %v589_v4  ;;  %v585_v8 = vld [vmem:[#allocation5 + $0x10] sm:$0xff]   ;;  %v587_v10 = vld [vmem:[#allocation5] sm:$0xff]   ;;  %v588_v11 = vld [vmem:[#allocation2] sm:$0xff]  }
  0x35   :  { %511 = vmatprep.subr.bf16.mxu0 %v727_v0  ;;  %531 = vmatprep.subr.bf16.mxu1 %v727_v0  ;;  %v591_v12 = vld [vmem:[#allocation7 + $0x28] sm:$0xff]   ;;  %v592_v13 = vld [vmem:[#allocation7 + $0x20] sm:$0xff]   ;;  %v593_v14 = vld [vmem:[#allocation7 + $0x18] sm:$0xff]  }
  0x36   :  { %v594_v15 = vld [vmem:[#allocation7 + $0x10] sm:$0xff]   ;;  %v595_v16 = vld [vmem:[#allocation7 + $0x8] sm:$0xff]   ;;  %v596_v17 = vld [vmem:[#allocation7] sm:$0xff]  }
  0x37   :  { %v597_v18 = vld [vmem:[#allocation8 + $0x38] sm:$0xff]   ;;  %v598_v19 = vld [vmem:[#allocation8 + $0x30] sm:$0xff]   ;;  %v599_v30 = vld [vmem:[#allocation8 + $0x28] sm:$0xff]  }
  0x38   :  { %512 = vmatpush3.bf16.msra.mxu0 %v581_v2  ;;  %532 = vmatpush3.bf16.msra.mxu1 %v590_v6  ;;  %v454_v20 = vld [vmem:[%s840_s2] ss:$0 sm:$0xff]  ;;  %v600_v31 = vld [vmem:[#allocation8 + $0x20] sm:$0xff]   ;;  %v602_v33 = vld [vmem:[#allocation8 + $0x10] sm:$0xff]  }
  0x39   :  { %513 = vmatprep.subr.bf16.mxu0 %v727_v0  ;;  %533 = vmatprep.subr.bf16.mxu1 %v727_v0  ;;  %v601_v32 = vld [vmem:[#allocation8 + $0x18] sm:$0xff]   ;;  %v603_v34 = vld [vmem:[#allocation8 + $0x8] sm:$0xff]   ;;  %v604_v35 = vld [vmem:[#allocation8] sm:$0xff]  }
  0x3a   :  { %v464_v36 = vld [vmem:[%s842_s4] ss:$0 sm:$0xff]  ;;  %s440_s4 = sshll.u32 %s729_s24, 4  ;;  %s441_s4 = int_to_ptr.vmem [resolvable:$true] %s440_s4 }
  0x3b   :  { %v473_v46 = vld [vmem:[%s844_s6] ss:$0 sm:$0xff]  ;;  %s693_s25 = scalar_lea.vmem %s441_s4, 256  ;;  %p698_p7 = scmp.lt.s32.totalorder %s441_s4, %s441_s4 }
  0x3c   :  { %514 = vmatpush3.bf16.msra.mxu0 %v582_v3  ;;  %534 = vmatpush3.bf16.msra.mxu1 %v591_v12  ;;  %p694_p6 = scmp.ne.s32.totalorder %s441_s4, %s693_s25  ;;  %p699_p8 = scmp.lt.s32.totalorder %s693_s25, %s693_s25 }
  0x3d   :  { %515 = vmatprep.subr.bf16.mxu0 %v727_v0  ;;  %535 = vmatprep.subr.bf16.mxu1 %v727_v0 }
  0x3e   :  { %p700_p9 = por %p699_p8, %p698_p7 }
  0x40   :  { %516 = vmatpush3.bf16.msra.mxu0 %v583_v5  ;;  %536 = vmatpush3.bf16.msra.mxu1 %v592_v13  ;;  %p701_p10 = pnand %p700_p9, %p694_p6 }
  0x41   :  { %517 = vmatprep.subr.bf16.mxu0 %v727_v0  ;;  %537 = vmatprep.subr.bf16.mxu1 %v727_v0 }
  0x44   :  { %518 = vmatpush3.bf16.msra.mxu0 %v584_v7  ;;  %538 = vmatpush3.bf16.msra.mxu1 %v593_v14 }
  0x45   :  { %519 = vmatprep.subr.bf16.mxu0 %v727_v0  ;;  %539 = vmatprep.subr.bf16.mxu1 %v727_v0 }
  0x48   :  { %520 = vmatpush3.bf16.msra.mxu0 %v585_v8  ;;  %540 = vmatpush3.bf16.msra.mxu1 %v594_v15 }
  0x49   :  { %521 = vmatprep.subr.bf16.mxu0 %v727_v0  ;;  %541 = vmatprep.subr.bf16.mxu1 %v727_v0 }
  0x4c   :  { %522 = vmatpush3.bf16.msra.mxu0 %v586_v9  ;;  %542 = vmatpush3.bf16.msra.mxu1 %v595_v16 }
  0x4d   :  { %523 = vmatprep.subr.bf16.mxu0 %v727_v0  ;;  %543 = vmatprep.subr.bf16.mxu1 %v727_v0 }
  0x50   :  { %524 = vmatpush3.bf16.msra.mxu0 %v587_v10  ;;  %544 = vmatpush3.bf16.msra.mxu1 %v596_v17 }
  0x51   :  { %549 = vmatprep.subr.bf16.mxu0 %v727_v0 }
  0x53   :  { %526 = vmatmul.mubr.bf16.vlgmr.msra.gmra.mxu0 %v588_v11 }
  0x54   :  { %565 = vmatprep.mubr.msk.bf16.mxu0 %vm728_vm0, %v727_v0  ;;  %550 = vmatpush3.bf16.msra.mxu0 %v597_v18 }
  0x55   :  { %551 = vmatprep.subr.bf16.mxu0 %v727_v0 }
  0x58   :  { %552 = vmatpush3.bf16.msra.mxu0 %v598_v19 }
  0x59   :  { %553 = vmatprep.subr.bf16.mxu0 %v727_v0 }
  0x5c   :  { %554 = vmatpush3.bf16.msra.mxu0 %v599_v30 }
  0x5d   :  { %555 = vmatprep.subr.bf16.mxu0 %v727_v0 }
  0x60   :  { %556 = vmatpush3.bf16.msra.mxu0 %v600_v31 }
  0x61   :  { %557 = vmatprep.subr.bf16.mxu0 %v727_v0 }
  0x64   :  { %558 = vmatpush3.bf16.msra.mxu0 %v601_v32 }
  0x65   :  { %559 = vmatprep.subr.bf16.mxu0 %v727_v0 }
  0x68   :  { %560 = vmatpush3.bf16.msra.mxu0 %v602_v33 }
  0x69   :  { %561 = vmatprep.subr.bf16.mxu0 %v727_v0 }
  0x6c   :  { %562 = vmatpush3.bf16.msra.mxu0 %v603_v34 }
  0x6d   :  { %563 = vmatprep.subr.bf16.mxu0 %v727_v0 }
  0x70   :  { %564 = vmatpush3.bf16.msra.mxu0 %v604_v35 }
 0x113   :  { %v196_v21 = vpop.f32.mrf.mxu0 }
 0x114   :  { %v197_v22 = vadd.f32 %v454_v20, %v196_v21 }
 0x115   :  { %v527_v23 = vpop.f32.mrf.mxu0 }
 0x116   :  { %605 = vtanh.f32 %v197_v22 }
 0x117   :  { %v199_v24 = vpop.f32.mrf.mxu0 }
 0x118   :  { %v200_v25 = vadd.f32 %v454_v20, %v199_v24 }
 0x119   :  { %v528_v26 = vpop.f32.mrf.mxu0 }
 0x11a   :  { %607 = vtanh.f32 %v200_v25 }
 0x123   :  { %v606_v27 = vpop.eup %605 }
 0x127   :  { %v608_v28 = vpop.eup %607 }
 0x128   :  { %v205_v29 = vpack.c.bf16 %v608_v28, %v606_v27 }
 0x12a   :  { %546 = vmatmul.mubr.bf16.vlgmr.msra.gmra.mxu1 %v205_v29 }
 0x1ea   :  { %v311_v37 = vpop.f32.mrf.mxu1 }
 0x1eb   :  { %v312_v38 = vadd.f32 %v464_v36, %v311_v37 }
 0x1ec   :  { %v547_v39 = vpop.f32.mrf.mxu1 }
 0x1ed   :  { %609 = vtanh.f32 %v312_v38 }
 0x1ee   :  { %v314_v40 = vpop.f32.mrf.mxu1 }
 0x1ef   :  { %v315_v41 = vadd.f32 %v464_v36, %v314_v40 }
 0x1f0   :  { %v548_v42 = vpop.f32.mrf.mxu1 }
 0x1f1   :  { %611 = vtanh.f32 %v315_v41 }
 0x1fa   :  { %v610_v43 = vpop.eup %609 }
 0x1fe   :  { %v612_v44 = vpop.eup %611 }
 0x1ff   :  { %v320_v45 = vpack.c.bf16 %v612_v44, %v610_v43 }
 0x201   :  { %566 = vmatmul.mubr.bf16.vlgmr.msra.gmra.mxu0 %v320_v45 }
 0x2c1   :  { %v426_v47 = vpop.f32.mrf.mxu0 }
 0x2c2   :  { %v427_v48 = vadd.f32 %v473_v46, %v426_v47 }
 0x2c3   :  { %v567_v49 = vpop.f32.mrf.mxu0 }
 0x2c4   :  { %433 = vst [vmem:[#allocation10] sm:$0xff] %v427_v48 }
 0x2c5   :  { %v429_v50 = vpop.f32.mrf.mxu0 }
 0x2c6   :  { %v430_v51 = vadd.f32 %v473_v46, %v429_v50 }
 0x2c7   :  { %v568_v52 = vpop.f32.mrf.mxu0 }
 0x2c8   :  { %434 = vst [vmem:[#allocation10 + $0x8] sm:$0xff] %v430_v51 }
 0x2c9   :  { %704 = shalt.err (!%p701_p10)
}
 0x2ca   :  { %s730_s26 = smov 128   ;;  %s731_s6 = smov 8  }
 0x2cb   :  { %446 = dma.vmem_to_hbm [thread:$0]  %s441_s4, 256, %s845_s7, [#allocation4], %s730_s26, %s730_s26, %s731_s6  }
 0x2cc   :  { %719 = dma.done.wait [#allocation4], 256  }
 0x2cd   :  { %720 = vsyncadd [#allocation4], 4294967040 }
 0x2ce   :  { %450 = vsyncpa [#allocation3], 1 }
 0x2cf   :  { %451 = vsyncpa [#allocation6], 1 }
 0x2d0   :  { %452 = vsyncpa [#allocation9], 1 }
 0x2d1   :  { %453 = vsyncpa [#allocation4], 1 }

</bundles_post_ra>
